<compile_context>
chip_gen: v5e
topology: v5e:2x2
jax: 0.10.0
libtpu: 0.0.40
codegen_flags: <defaults>
</compile_context>

<pallas_src>
import functools

import jax
import jax.numpy as jnp
from jax.experimental import pallas as pl
from jax.experimental.pallas import tpu as pltpu


# ---------------------------------------------------------------------------
# Pallas kernel: one (batch, row-tile, cout-tile) block of the fused conv.
# ---------------------------------------------------------------------------
def _repvgg_kernel(x_ref, w_ref, b_ref, o_ref):
    # x_ref: (1, 1, TH+2, W+2, C)  bf16  padded/halo'd activation row tile
    # w_ref: (9*C, TCo)            bf16  BN-folded 3x3 (+1x1 center) weights
    # b_ref: (1, TCo)              f32   BN-folded bias (both branches)
    # o_ref: (1, TH, W, TCo)       f32
    _, _, THp, Wp, C = x_ref.shape
    TH, W = THp - 2, Wp - 2
    TCo = o_ref.shape[-1]

    xb = x_ref[0, 0]  # (TH+2, W+2, C), bf16

    # im2col: gather the 9 shifted taps and concatenate along the lane
    # (channel) axis -> one (TH*W, 9*C) LHS so the MXU accumulates all nine
    # taps internally (single dot, no 8 full-tile VPU adds / MRF pops).
    taps = []
    for kh in range(3):
        for kw in range(3):
            taps.append(xb[kh:kh + TH, kw:kw + W, :])
    patches = jnp.concatenate(taps, axis=-1).reshape(TH * W, 9 * C)

    acc = jnp.dot(patches, w_ref[...], preferred_element_type=jnp.float32)
    acc = acc + b_ref[...]                      # (1, TCo) broadcasts over rows
    out = jnp.maximum(acc, 0.0)                 # ReLU
    o_ref[0] = out.reshape(TH, W, TCo).astype(o_ref.dtype)


# ---------------------------------------------------------------------------
# Parameter folding / tiling helpers
# ---------------------------------------------------------------------------
def _fold_bn(w_oihw, gamma, beta, mean, var, eps=1e-5):
    """Fold BatchNorm (running stats) into conv weight/bias. Returns HWIO, bias."""
    std = jnp.sqrt(var + eps)
    scale = gamma / std                                  # (Cout,)
    w_folded = w_oihw * scale[:, None, None, None]       # (Cout, Cin, kh, kw)
    b_folded = beta - mean * scale                       # (Cout,)
    w_hwio = jnp.transpose(w_folded, (2, 3, 1, 0))       # (kh, kw, Cin, Cout)
    return w_hwio, b_folded


def _choose_tile_h(H, W, C, TCo, budget_bytes=6 * 1024 * 1024):
    """Largest row-tile TH dividing H whose per-step working set fits budget."""
    Wp = W + 2
    for th in range(H, 0, -1):
        if H % th:
            continue
        need = ((th + 2) * Wp * C * 2      # bf16 input tile
                + th * W * 9 * C * 2       # bf16 im2col patches
                + th * W * TCo * 8)        # f32 accumulator + f32 output tile
        if need <= budget_bytes:
            return th
    return 1


# ---------------------------------------------------------------------------
# Forward wrapper (PyTorch-facing NCHW interface)
# ---------------------------------------------------------------------------
def repvgg_block_forward(x_nchw, params):
    """x_nchw: (N, C, H, W) float32 -> (N, Cout, H, W) float32."""
    # BN fold per branch, then fold the 1x1 branch into the 3x3 center tap
    # (exact: conv1x1 pad=0 == center tap of conv3x3 pad=1 under zero padding).
    w3, b3 = _fold_bn(params["w3"], params["bn3_gamma"], params["bn3_beta"],
                      params["bn3_mean"], params["bn3_var"])   # (3,3,C,Cout)
    w1, b1 = _fold_bn(params["w1"], params["bn1_gamma"], params["bn1_beta"],
                      params["bn1_mean"], params["bn1_var"])   # (1,1,C,Cout)
    w = w3.at[1, 1].add(w1[0, 0])
    b = b3 + b1

    N, C, H, W = x_nchw.shape
    Cout = w.shape[-1]
    Wp = W + 2

    # Output-channel tile: multiple of 128 when possible (lane-dense stores).
    if Cout % 256 == 0:
        TCo = 256
    elif Cout % 128 == 0:
        TCo = 128
    else:
        TCo = Cout
    nCo = Cout // TCo

    TH = _choose_tile_h(H, W, C, TCo)
    nH = H // TH
    THp = TH + 2

    # NCHW -> NHWC (channels on the lane dim), bf16 for the MXU.
    x_nhwc = jnp.transpose(x_nchw, (0, 2, 3, 1)).astype(jnp.bfloat16)
    x_pad = jnp.pad(x_nhwc, ((0, 0), (1, 1), (1, 1), (0, 0)))
    # Row tiles, each with its own 1-row halo (duplicates 2 rows per tile);
    # under jit XLA fuses transpose+pad+cast+stack into one activation pass.
    # TODO(synk): replace with in-kernel halo fetch (pl.Element H offsets or
    # manual DMA) to drop this extra wrapper pass for very large H.
    x_tiles = jnp.stack([x_pad[:, h * TH:h * TH + THp] for h in range(nH)],
                        axis=1)                        # (N, nH, THp, Wp, C)

    w9 = w.reshape(9 * C, Cout).astype(jnp.bfloat16)   # tap-major (kh, kw, C)
    b2 = b.reshape(1, Cout).astype(jnp.float32)

    flops = 2 * N * H * W * 9 * C * Cout
    bytes_accessed = (x_tiles.size * 2 + w9.size * 2 + b2.size * 4
                      + N * H * W * Cout * 4)

    out_nhwc = pl.pallas_call(
        _repvgg_kernel,
        out_shape=jax.ShapeDtypeStruct((N, H, W, Cout), jnp.float32),
        grid=(N, nH, nCo),
        in_specs=[
            # activation row tile: independent of the Cout-tile axis -> stays
            # VMEM resident across the innermost (co) iterations.
            pl.BlockSpec((1, 1, THp, Wp, C), lambda n, h, co: (n, h, 0, 0, 0)),
            # weights / bias: constant along N and H -> VMEM resident.
            pl.BlockSpec((9 * C, TCo), lambda n, h, co: (0, co)),
            pl.BlockSpec((1, TCo), lambda n, h, co: (0, co)),
        ],
        out_specs=pl.BlockSpec((1, TH, W, TCo), lambda n, h, co: (n, h, 0, co)),
        compiler_params=pltpu.CompilerParams(
            dimension_semantics=("parallel", "parallel", "parallel"),
            vmem_limit_bytes=32 * 1024 * 1024),
        cost_estimate=pl.CostEstimate(flops=flops, transcendentals=0,
                                      bytes_accessed=bytes_accessed),
    )(x_tiles, w9, b2)

    return jnp.transpose(out_nhwc, (0, 3, 1, 2))  # back to NCHW


# ---------------------------------------------------------------------------
# Plain-JAX reference (unfused two-branch forward) and test params
# ---------------------------------------------------------------------------
def _reference_forward(x_nchw, params):
    w3, b3 = _fold_bn(params["w3"], params["bn3_gamma"], params["bn3_beta"],
                      params["bn3_mean"], params["bn3_var"])
    w1, b1 = _fold_bn(params["w1"], params["bn1_gamma"], params["bn1_beta"],
                      params["bn1_mean"], params["bn1_var"])
    x = jnp.transpose(x_nchw, (0, 2, 3, 1))
    dn = jax.lax.conv_dimension_numbers(x.shape, w3.shape,
                                        ("NHWC", "HWIO", "NHWC"))
    y3 = jax.lax.conv_general_dilated(x, w3, (1, 1), ((1, 1), (1, 1)),
                                      dimension_numbers=dn) + b3
    y1 = jax.lax.conv_general_dilated(x, w1, (1, 1), ((0, 0), (0, 0)),
                                      dimension_numbers=dn) + b1
    y = jnp.maximum(y3 + y1, 0.0)
    return jnp.transpose(y, (0, 3, 1, 2))


def make_params(key, in_channels, out_channels):
    ks = jax.random.split(key, 10)
    w3 = jax.random.normal(ks[0], (out_channels, in_channels, 3, 3),
                           jnp.float32) * 0.1
    w1 = jax.random.normal(ks[1], (out_channels, in_channels, 1, 1),
                           jnp.float32) * 0.1
    return {
        "w3": w3,
        "bn3_gamma": 1.0 + 0.1 * jax.random.normal(ks[2], (out_channels,),
                                                   jnp.float32),
        "bn3_beta": 0.1 * jax.random.normal(ks[3], (out_channels,),
                                            jnp.float32),
        "bn3_mean": 0.1 * jax.random.normal(ks[4], (out_channels,),
                                            jnp.float32),
        "bn3_var": jax.random.uniform(ks[5], (out_channels,), jnp.float32,
                                      0.5, 1.5),
        "w1": w1,
        "bn1_gamma": 1.0 + 0.1 * jax.random.normal(ks[6], (out_channels,),
                                                   jnp.float32),
        "bn1_beta": 0.1 * jax.random.normal(ks[7], (out_channels,),
                                            jnp.float32),
        "bn1_mean": 0.1 * jax.random.normal(ks[8], (out_channels,),
                                            jnp.float32),
        "bn1_var": jax.random.uniform(ks[9], (out_channels,), jnp.float32,
                                      0.5, 1.5),
    }


if __name__ == "__main__":
    key = jax.random.PRNGKey(0)
    kx, kp = jax.random.split(key)

    N, C_in, C_out, H, W = 2, 4, 4, 16, 16
    x = jax.random.normal(kx, (N, C_in, H, W), jnp.float32)
    params = make_params(kp, C_in, C_out)

    fwd = jax.jit(repvgg_block_forward)
    out = jax.block_until_ready(fwd(x, params))

    ref = _reference_forward(x, params)
    assert out.shape == (N, C_out, H, W)
    max_err = float(jnp.max(jnp.abs(out - ref)))
    # bf16 activations/weights (f32 accumulate) -> loosened tolerance.
    assert jnp.allclose(out, ref, atol=5e-2, rtol=5e-2), (
        f"mismatch vs reference (max abs err {max_err})")

    print("KERNEL_OK")
</pallas_src>

<mosaic_0001>
module attributes {stable_mosaic.version = 11 : i64} {
  func.func @_repvgg_kernel(%arg0: i32, %arg1: i32, %arg2: i32, %arg3: memref<1x1x18x18x4xbf16, #tpu.memory_space<vmem>>, %arg4: memref<36x4xbf16, #tpu.memory_space<vmem>>, %arg5: memref<1x4xf32, #tpu.memory_space<vmem>>, %arg6: memref<1x16x16x4xf32, #tpu.memory_space<vmem>>) attributes {dimension_semantics = [#tpu.dimension_semantics<parallel>, #tpu.dimension_semantics<parallel>, #tpu.dimension_semantics<parallel>], iteration_bounds = array<i64: 2, 1, 1>, scalar_prefetch = 0 : i64, scratch_operands = 0 : i64, tpu.core_type = #tpu.core_type<tc>, window_params = [{transform_indices = @transform_0, window_bounds = array<i64: 1, 1, 18, 18, 4>}, {transform_indices = @transform_1, window_bounds = array<i64: 36, 4>}, {transform_indices = @transform_2, window_bounds = array<i64: 1, 4>}, {transform_indices = @transform_3, window_bounds = array<i64: 1, 16, 16, 4>}]} {
    %c0 = arith.constant 0 : index
    %c0_0 = arith.constant 0 : index
    %c0_1 = arith.constant 0 : index
    %c0_2 = arith.constant 0 : index
    %c0_3 = arith.constant 0 : index
    %0 = vector.load %arg3[%c0, %c0_0, %c0_1, %c0_2, %c0_3] : memref<1x1x18x18x4xbf16, #tpu.memory_space<vmem>>, vector<1x1x18x18x4xbf16>
    %1 = vector.shape_cast %0 : vector<1x1x18x18x4xbf16> to vector<18x18x4xbf16>
    %2 = vector.extract_strided_slice %1 {offsets = [0, 0, 0], sizes = [16, 16, 4], strides = [1, 1, 1]} : vector<18x18x4xbf16> to vector<16x16x4xbf16>
    %3 = vector.extract_strided_slice %1 {offsets = [0, 1, 0], sizes = [16, 16, 4], strides = [1, 1, 1]} : vector<18x18x4xbf16> to vector<16x16x4xbf16>
    %4 = vector.extract_strided_slice %1 {offsets = [0, 2, 0], sizes = [16, 16, 4], strides = [1, 1, 1]} : vector<18x18x4xbf16> to vector<16x16x4xbf16>
    %5 = vector.extract_strided_slice %1 {offsets = [1, 0, 0], sizes = [16, 16, 4], strides = [1, 1, 1]} : vector<18x18x4xbf16> to vector<16x16x4xbf16>
    %6 = vector.extract_strided_slice %1 {offsets = [1, 1, 0], sizes = [16, 16, 4], strides = [1, 1, 1]} : vector<18x18x4xbf16> to vector<16x16x4xbf16>
    %7 = vector.extract_strided_slice %1 {offsets = [1, 2, 0], sizes = [16, 16, 4], strides = [1, 1, 1]} : vector<18x18x4xbf16> to vector<16x16x4xbf16>
    %8 = vector.extract_strided_slice %1 {offsets = [2, 0, 0], sizes = [16, 16, 4], strides = [1, 1, 1]} : vector<18x18x4xbf16> to vector<16x16x4xbf16>
    %9 = vector.extract_strided_slice %1 {offsets = [2, 1, 0], sizes = [16, 16, 4], strides = [1, 1, 1]} : vector<18x18x4xbf16> to vector<16x16x4xbf16>
    %10 = vector.extract_strided_slice %1 {offsets = [2, 2, 0], sizes = [16, 16, 4], strides = [1, 1, 1]} : vector<18x18x4xbf16> to vector<16x16x4xbf16>
    %11 = tpu.concatenate %2, %3, %4, %5, %6, %7, %8, %9, %10 in 2 : vector<16x16x4xbf16>, vector<16x16x4xbf16>, vector<16x16x4xbf16>, vector<16x16x4xbf16>, vector<16x16x4xbf16>, vector<16x16x4xbf16>, vector<16x16x4xbf16>, vector<16x16x4xbf16>, vector<16x16x4xbf16> -> vector<16x16x36xbf16>
    %12 = vector.shape_cast %11 : vector<16x16x36xbf16> to vector<256x36xbf16>
    %c0_4 = arith.constant 0 : index
    %c0_5 = arith.constant 0 : index
    %13 = vector.load %arg4[%c0_4, %c0_5] : memref<36x4xbf16, #tpu.memory_space<vmem>>, vector<36x4xbf16>
    %cst = arith.constant dense<0.000000e+00> : vector<256x4xf32>
    %14 = tpu.matmul %12, %13, %cst {dimension_numbers = #tpu.dot_dimension_numbers<[1], [0], [0], [1], [0, 0, 1, 1], [], []>} : vector<256x36xbf16>, vector<36x4xbf16>, vector<256x4xf32> -> vector<256x4xf32>
    %c0_6 = arith.constant 0 : index
    %c0_7 = arith.constant 0 : index
    %15 = vector.load %arg5[%c0_6, %c0_7] : memref<1x4xf32, #tpu.memory_space<vmem>>, vector<1x4xf32>
    %16 = vector.broadcast %15 : vector<1x4xf32> to vector<256x4xf32>
    %17 = arith.addf %14, %16 : vector<256x4xf32>
    %cst_8 = arith.constant 0.000000e+00 : f32
    %18 = vector.broadcast %cst_8 : f32 to vector<256x4xf32>
    %19 = arith.maximumf %17, %18 : vector<256x4xf32>
    %20 = vector.shape_cast %19 : vector<256x4xf32> to vector<16x16x4xf32>
    %c0_9 = arith.constant 0 : index
    %c0_10 = arith.constant 0 : index
    %c0_11 = arith.constant 0 : index
    %c0_12 = arith.constant 0 : index
    %21 = vector.load %arg6[%c0_9, %c0_10, %c0_11, %c0_12] : memref<1x16x16x4xf32, #tpu.memory_space<vmem>>, vector<1x16x16x4xf32>
    %22 = vector.shape_cast %21 : vector<1x16x16x4xf32> to vector<16x16x4xf32>
    %23 = vector.shape_cast %20 : vector<16x16x4xf32> to vector<1x16x16x4xf32>
    tpu.vector_store %arg6[%c0_9, %c0_10, %c0_11, %c0_12], %23 {strides = array<i32>} : memref<1x16x16x4xf32, #tpu.memory_space<vmem>>, vector<1x16x16x4xf32>,
    return
  }
  func.func @transform_0(%arg0: i32, %arg1: i32, %arg2: i32) -> (i32, i32, i32, i32, i32) {
    %c0_i32 = arith.constant 0 : i32
    %c0_i32_0 = arith.constant 0 : i32
    %c0_i32_1 = arith.constant 0 : i32
    %c0_i32_2 = arith.constant 0 : i32
    return %arg0, %arg1, %c0_i32, %c0_i32_0, %c0_i32_1 : i32, i32, i32, i32, i32
  }
  func.func @transform_1(%arg0: i32, %arg1: i32, %arg2: i32) -> (i32, i32) {
    %c0_i32 = arith.constant 0 : i32
    %c0_i32_0 = arith.constant 0 : i32
    return %c0_i32, %arg2 : i32, i32
  }
  func.func @transform_2(%arg0: i32, %arg1: i32, %arg2: i32) -> (i32, i32) {
    %c0_i32 = arith.constant 0 : i32
    %c0_i32_0 = arith.constant 0 : i32
    return %c0_i32, %arg2 : i32, i32
  }
  func.func @transform_3(%arg0: i32, %arg1: i32, %arg2: i32) -> (i32, i32, i32, i32) {
    %c0_i32 = arith.constant 0 : i32
    %c0_i32_0 = arith.constant 0 : i32
    return %arg0, %arg1, %c0_i32, %arg2 : i32, i32, i32, i32
  }
}

</mosaic_0001>

<bundles_post_ra>
// kernel: repvgg_block_forward.1
= control target key start
LH: loop header
LB: loop body
LE: loop exit
PB: predicated region body
PF: predicated region fallthrough
CT: control target
= control target key end

     0   :  { %s1822_s12 = smov 0   ;;  %s1824_s13 = smov 0   ;;  %s2745_s0 = inlined_call_operand.vmem [shape: bf16[2,1,18,18,4], index: 0, kind: input, shape index: {}]   ;;  %s2746_s1 = inlined_call_operand.vmem [shape: bf16[36,4], index: 1, kind: input, shape index: {}]   ;;  %s2747_s2 = inlined_call_operand.vmem [shape: f32[1,4], index: 2, kind: input, shape index: {}]   ;;  %s2748_s3 = inlined_call_operand.vmem [shape: f32[2,16,16,4], index: 3, kind: output, shape index: {}]  }
   0x1   :  { %s1826_s14 = smov 0  }
   0x2 LB: > { %s32_s15 = sadd.s32 1, %s1788_s13  ;;  %p1603_p0 = scmp.ge.s32.totalorder %s1792_s14, 1  ;;  %s1792_s14 = sphi %s1826_s14, %s13_s14   ;;  %s1788_s13 = sphi %s1824_s13, %s2759_s13   ;;  %s1784_s12 = sphi %s1822_s12, %s2758_s12  }
   0x3   : > { %p34_p1 = scmp.ge.s32.totalorder %s32_s15, 2  ;;  %p183_p2 = scmp.lt.s32.totalorder %s1792_s14, 3 }
   0x5   : > { %s2761_s15 = smov (%p34_p1, %s32_s15), 0  ;;  %p184_p3 = pnand %p1603_p0, %p183_p2 }
   0x7   : > { %187 = sbr.rel (%p184_p3) target bundleno = 620 (0x26c), region = 32 }
   0xc   : > { %p226_p4 = scmp.lt.s32.totalorder %s1784_s12, 1  ;;  %vm439_vm0 = vsmask.f32 7424  ;;  %s1794_s20 = smov 4   ;;  %vm664_vm1 = vcmask 1046528   ;;  %vm1016_vm2 = vcmask 64512  }
   0xd   : > { %s1795_s21 = smov 8   ;;  %s1796_s22 = smov 12   ;;  %vm983_vm3 = vcmask 31744   ;;  %vm1049_vm4 = vcmask 97280   ;;  %vm1304_vm5 = vcmask 1041408   ;;  %vm1082_vm6 = vcmask 130048  }
   0xe   : > { %s2763_s12 = smov (!%p226_p4, %s1784_s12), 1  ;;  %s1797_s23 = smov 16   ;;  %vm1115_vm7 = vcmask 162816   ;;  %vm1148_vm8 = vcmask 195584   ;;  %vm1181_vm9 = vcmask 228352   ;;  %vm1214_vm10 = vcmask 261120  }
   0xf   : > { %s1735_s16 = smul.u32 216, %s2763_s12  ;;  %s1798_s24 = smov 20   ;;  %vm1271_vm11 = vcmask 293888  }
  0x10   : > { %s1799_s25 = smov 28   ;;  %s1800_s26 = smov 24  }
  0x11   : > { %s1846_s19 = scalar_lea.vmem %s2745_s0, %s1735_s16  ;;  %s1801_s27 = smov 32  }
  0x12   : > { %v1849_v0 = vld [vmem:[%s1846_s19 + $0x30] sm:$0xff]  ;;  %v271_v1 = vld [vmem:[%s1846_s19 + $0x38] sm:$0x1]  ;;  %v265_v4 = vld [vmem:[%s1846_s19 + $0x20] sm:$0x1]  ;;  %s1705_s9 = sshll.u32 %s2763_s12, 8 }
  0x13   : > { %v1853_v2 = vld [vmem:[%s1846_s19 + $0x18] sm:$0xff]  ;;  %v411_v3 = vunpack.c.l.b16 %v271_v1  ;;  %v1857_v5 = vld [vmem:[%s1846_s19] sm:$0xff]  ;;  %v259_v6 = vld [vmem:[%s1846_s19 + $0x8] sm:$0x1]  ;;  %v489_v7 = vshrl.u32 %v1849_v0, 16  ;;  %v491_v8 = vshll.u32 %v1849_v0, 16  ;;  %v409_v9 = vunpack.c.l.b16 %v265_v4  ;;  %s2611_s16 = scalar_lea.vmem %s2748_s3, %s1705_s9 }
  0x14   : > { %v465_v10 = vshrl.u32 %v1853_v2, 16  ;;  %v274_v11 = vld [vmem:[%s1846_s19 + $0x44] sm:$0x1]  ;;  %v467_v13 = vshll.u32 %v1853_v2, 16  ;;  %v407_v14 = vunpack.c.l.b16 %v259_v6  ;;  %v441_v15 = vshrl.u32 %v1857_v5, 16  ;;  %v1869_v16 = vld [vmem:[%s1846_s19 + $0x3c] sm:$0xff] }
  0x15   : > { %v1864_v12 = vpack.c.b16 %v411_v3, %v411_v3  ;;  %v493_v17 = vrot.slane %v491_v8, 1  ;;  %v1871_v18 = vpack.c.b16 %v409_v9, %v409_v9  ;;  %v443_v19 = vshll.u32 %v1857_v5, 16  ;;  %v268_v25 = vld [vmem:[%s1846_s19 + $0x2c] sm:$0x1]  ;;  %v1883_v30 = vld [vmem:[%s1846_s19 + $0x24] sm:$0xff]  ;;  %v1916_v59 = vld [vmem:[%s1846_s19 + $0x54] sm:$0xff] }
  0x16   : > { %v412_v20 = vunpack.c.l.b16 %v274_v11  ;;  %v469_v22 = vrot.slane %v467_v13, 1  ;;  %v1875_v23 = vpack.c.b16 %v407_v14, %v407_v14  ;;  %v501_v24 = vshrl.u32 %v1869_v16, 16  ;;  %v1889_v39 = vld [vmem:[%s1846_s19 + $0xc] sm:$0xff]  ;;  %v262_v40 = vld [vmem:[%s1846_s19 + $0x14] sm:$0x1]  ;;  %v1897_v45 = vld [vmem:[%s1846_s19 + $0x60] sm:$0xff] }
  0x17   : > { %v496_v21 = vshll.u32 %v1864_v12, 16  ;;  %v494_v26 = vor.u32 %v493_v17, %v489_v7  ;;  %v472_v27 = vshll.u32 %v1871_v18, 16  ;;  %v445_v28 = vrot.slane %v443_v19, 1  ;;  %v283_v46 = vld [vmem:[%s1846_s19 + $0x68] sm:$0x1] }
  0x18   : > { %v1880_v29 = vpack.c.b16 %v412_v20, %v412_v20  ;;  %v470_v32 = vor.u32 %v469_v22, %v465_v10  ;;  %v448_v33 = vshll.u32 %v1875_v23, 16  ;;  %v503_v34 = vshll.u32 %v1869_v16, 16  ;;  %v280_v60 = vld [vmem:[%s1846_s19 + $0x5c] sm:$0x1]  ;;  %v1929_v8 = vld [vmem:[%s1846_s19 + $0x48] sm:$0xff] }
  0x19   : > { %v498_v31 = vrot.slane %v496_v21, 1  ;;  %v474_v35 = vrot.slane %v472_v27, 1  ;;  %v446_v36 = vor.u32 %v445_v28, %v441_v15  ;;  %v410_v38 = vunpack.c.l.b16 %v268_v25  ;;  %v277_v9 = vld [vmem:[%s1846_s19 + $0x50] sm:$0x1]  ;;  %v292_v21 = vld [vmem:[%s1846_s19 + $0x8c] sm:$0x1] }
  0x1a   : > { %v508_v37 = vshll.u32 %v1880_v29, 16  ;;  %v450_v42 = vrot.slane %v448_v33, 1  ;;  %v505_v43 = vrot.slane %v503_v34, 1  ;;  %v477_v44 = vshrl.u32 %v1883_v30, 16  ;;  %v1943_v27 = vld [vmem:[%s1846_s19 + $0x84] sm:$0xff]  ;;  %v1950_v34 = vld [vmem:[%s1846_s19 + $0x78] sm:$0xff] }
  0x1b   : > { %v1893_v41 = vsel %vm439_vm0, %v494_v26, %v498_v31  ;;  %v1903_v47 = vsel %vm439_vm0, %v470_v32, %v474_v35  ;;  %v1905_v49 = vpack.c.b16 %v410_v38, %v410_v38  ;;  %v479_v50 = vshll.u32 %v1883_v30, 16 }
  0x1c   : > { %640 = vrot.lane.b32.xlu2 %v1893_v41, %s1794_s20  ;;  %v510_v48 = vrot.slane %v508_v37, 1  ;;  %636 = vrot.lane.b32.xlu1 %v1903_v47, %s1794_s20  ;;  %v451_v51 = vsel %vm439_vm0, %v446_v36, %v450_v42  ;;  %v506_v52 = vor.u32 %v505_v43, %v501_v24  ;;  %v408_v53 = vunpack.c.l.b16 %v262_v40  ;;  %v289_v40 = vld [vmem:[%s1846_s19 + $0x80] sm:$0x1] }
  0x1d   : > { %v453_v54 = vshrl.u32 %v1889_v39, 16  ;;  %632 = vrot.lane.b32.xlu0 %v451_v51, %s1794_s20  ;;  %v481_v55 = vrot.slane %v479_v50, 1  ;;  %v484_v56 = vshll.u32 %v1905_v49, 16  ;;  %v455_v57 = vshll.u32 %v1889_v39, 16 }
  0x1e   : > { %v415_v58 = vunpack.c.l.b16 %v283_v46  ;;  %v1920_v61 = vsel %vm439_vm0, %v506_v52, %v510_v48  ;;  %v1922_v62 = vpack.c.b16 %v408_v53, %v408_v53  ;;  %v537_v63 = vshrl.u32 %v1897_v45, 16  ;;  %v1969_v52 = vld [vmem:[%s1846_s19 + $0x6c] sm:$0xff]  ;;  %v286_v53 = vld [vmem:[%s1846_s19 + $0x74] sm:$0x1] }
  0x1f   : > { %v539_v1 = vshll.u32 %v1897_v45, 16  ;;  %v482_v3 = vor.u32 %v481_v55, %v477_v44  ;;  %v486_v4 = vrot.slane %v484_v56, 1  ;;  %v457_v6 = vrot.slane %v455_v57, 1 }
  0x20   : > { %v1926_v7 = vpack.c.b16 %v415_v58, %v415_v58  ;;  %v460_v10 = vshll.u32 %v1922_v62, 16  ;;  %v414_v13 = vunpack.c.l.b16 %v280_v60  ;;  %v525_v14 = vshrl.u32 %v1916_v59, 16  ;;  %v1977_v58 = vld [vmem:[%s1846_s19 + $0xa8] sm:$0xff] }
  0x21   : > { %v541_v11 = vrot.slane %v539_v1, 1  ;;  %v1935_v15 = vsel %vm439_vm0, %v482_v3, %v486_v4  ;;  %v458_v17 = vor.u32 %v457_v6, %v453_v54  ;;  %v527_v20 = vshll.u32 %v1916_v59, 16  ;;  %v301_v4 = vld [vmem:[%s1846_s19 + $0xb0] sm:$0x1] }
  0x22   : > { %v544_v19 = vshll.u32 %v1926_v7, 16  ;;  %v462_v22 = vrot.slane %v460_v10, 1  ;;  %v1940_v25 = vpack.c.b16 %v414_v13, %v414_v13  ;;  %v413_v26 = vunpack.c.l.b16 %v277_v9 }
  0x23   : > { %v542_v24 = vor.u32 %v541_v11, %v537_v63  ;;  %v529_v31 = vrot.slane %v527_v20, 1  ;;  %v513_v32 = vshrl.u32 %v1929_v8, 16  ;;  %v515_v33 = vshll.u32 %v1929_v8, 16  ;;  %v1993_v20 = vld [vmem:[%s1846_s19 + $0x9c] sm:$0xff] }
  0x24   : > { %642 = vrot.lane.b32.xlu2 %v1920_v61, %s1794_s20  ;;  %v546_v28 = vrot.slane %v544_v19, 1  ;;  %638 = vrot.lane.b32.xlu1 %v1935_v15, %s1794_s20  ;;  %v1955_v35 = vsel %vm439_vm0, %v458_v17, %v462_v22  ;;  %v532_v36 = vshll.u32 %v1940_v25, 16  ;;  %v1958_v37 = vpack.c.b16 %v413_v26, %v413_v26 }
  0x25   : > { %v418_v38 = vunpack.c.l.b16 %v292_v21  ;;  %634 = vrot.lane.b32.xlu0 %v1955_v35, %s1794_s20  ;;  %v530_v42 = vor.u32 %v529_v31, %v525_v14  ;;  %v517_v43 = vrot.slane %v515_v33, 1  ;;  %v573_v44 = vshrl.u32 %v1943_v27, 16  ;;  %v298_v21 = vld [vmem:[%s1846_s19 + $0xa4] sm:$0x1] }
  0x26   : > { %v534_v46 = vrot.slane %v532_v36, 1  ;;  %v520_v48 = vshll.u32 %v1958_v37, 16  ;;  %v575_v51 = vshll.u32 %v1943_v27, 16  ;;  %v1973_v54 = vsel %vm439_vm0, %v542_v24, %v546_v28 }
  0x27   : > { %v1965_v50 = vpack.c.b16 %v418_v38, %v418_v38  ;;  %v518_v55 = vor.u32 %v517_v43, %v513_v32  ;;  %v417_v56 = vunpack.c.l.b16 %v289_v40  ;;  %v563_v57 = vshll.u32 %v1950_v34, 16  ;;  %v2010_v43 = vld [vmem:[%s1846_s19 + $0x90] sm:$0xff] }
  0x28   : > { %v522_v60 = vrot.slane %v520_v48, 1  ;;  %v577_v63 = vrot.slane %v575_v51, 1  ;;  %v561_v3 = vshrl.u32 %v1950_v34, 16  ;;  %v1983_v6 = vsel %vm439_vm0, %v530_v42, %v534_v46 }
  0x29   : > { %v580_v1 = vshll.u32 %v1965_v50, 16  ;;  %v1985_v9 = vpack.c.b16 %v417_v56, %v417_v56  ;;  %v565_v10 = vrot.slane %v563_v57, 1  ;;  %v416_v11 = vunpack.c.l.b16 %v286_v53 }
  0x2a   : > { %v1988_v13 = vsel %vm439_vm0, %v518_v55, %v522_v60  ;;  %v578_v14 = vor.u32 %v577_v63, %v573_v44  ;;  %v549_v17 = vshrl.u32 %v1969_v52, 16  ;;  %v551_v19 = vshll.u32 %v1969_v52, 16  ;;  %v295_v44 = vld [vmem:[%s1846_s19 + $0x98] sm:$0x1] }
  0x2b   : > { %v582_v22 = vrot.slane %v580_v1, 1  ;;  %v568_v24 = vshll.u32 %v1985_v9, 16  ;;  %v1999_v26 = vpack.c.b16 %v416_v11, %v416_v11  ;;  %v421_v28 = vunpack.c.l.b16 %v301_v4 }
  0x2c   : > { %648 = vrot.lane.b32.xlu2 %v1973_v54, %s1794_s20  ;;  %646 = vrot.lane.b32.xlu1 %v1983_v6, %s1794_s20  ;;  %v566_v31 = vor.u32 %v565_v10, %v561_v3  ;;  %v553_v32 = vrot.slane %v551_v19, 1  ;;  %v611_v33 = vshll.u32 %v1977_v58, 16  ;;  %v420_v42 = vunpack.c.l.b16 %v298_v21 }
  0x2d   : > { %644 = vrot.lane.b32.xlu0 %v1988_v13, %s1794_s20  ;;  %v570_v36 = vrot.slane %v568_v24, 1  ;;  %v556_v38 = vshll.u32 %v1999_v26, 16  ;;  %v2007_v40 = vpack.c.b16 %v421_v28, %v421_v28  ;;  %v599_v48 = vshll.u32 %v1993_v20, 16 }
  0x2e   : > { %v554_v46 = vor.u32 %v553_v32, %v549_v17  ;;  %v2015_v51 = vsel %vm439_vm0, %v578_v14, %v582_v22  ;;  %v609_v55 = vshrl.u32 %v1977_v58, 16  ;;  %v2018_v56 = vpack.c.b16 %v420_v42, %v420_v42  ;;  %v304_v14 = vld [vmem:[%s1846_s19 + $0xbc] sm:$0x1]  ;;  %v2035_v22 = vld [vmem:[%s1846_s19 + $0xb4] sm:$0xff] }
  0x2f   : > { %v558_v53 = vrot.slane %v556_v38, 1  ;;  %v613_v57 = vrot.slane %v611_v33, 1  ;;  %v616_v60 = vshll.u32 %v2007_v40, 16  ;;  %v597_v63 = vshrl.u32 %v1993_v20, 16 }
  0x30   : > { %v419_v1 = vunpack.c.l.b16 %v295_v44  ;;  %v2023_v3 = vsel %vm439_vm0, %v566_v31, %v570_v36  ;;  %v601_v4 = vrot.slane %v599_v48, 1  ;;  %v604_v10 = vshll.u32 %v2018_v56, 16 }
  0x31   : > { %v587_v11 = vshll.u32 %v2010_v43, 16  ;;  %v2029_v17 = vsel %vm439_vm0, %v554_v46, %v558_v53  ;;  %v585_v21 = vshrl.u32 %v2010_v43, 16  ;;  %v614_v28 = vor.u32 %v613_v57, %v609_v55 }
  0x32   : > { %2752 = vst [vmem:[#allocation2_spill] sm:$0xff] %v2029_v17  ;;  %v2031_v19 = vpack.c.b16 %v419_v1, %v419_v1  ;;  %v618_v31 = vrot.slane %v616_v60, 1  ;;  %v422_v33 = vunpack.c.l.b16 %v304_v14  ;;  %v602_v36 = vor.u32 %v601_v4, %v597_v63 }
  0x33   : > { %v589_v24 = vrot.slane %v587_v11, 1  ;;  %v606_v38 = vrot.slane %v604_v10, 1  ;;  %v623_v48 = vshll.u32 %v2035_v22, 16  ;;  %v621_v60 = vshrl.u32 %v2035_v22, 16 }
  0x34   : > { %654 = vrot.lane.b32.xlu2 %v2015_v51, %s1794_s20  ;;  %652 = vrot.lane.b32.xlu1 %v2023_v3, %s1794_s20  ;;  %v592_v32 = vshll.u32 %v2031_v19, 16  ;;  %v2044_v46 = vpack.c.b16 %v422_v33, %v422_v33  ;;  %v2048_v53 = vsel %vm439_vm0, %v614_v28, %v618_v31  ;;  %v668_v4 = vrot.slane %v1889_v39, 1 }
  0x35   : > { %650 = vrot.lane.b32.xlu0 %v2029_v17, %s1794_s20  ;;  %v590_v42 = vor.u32 %v589_v24, %v585_v21  ;;  %v2051_v55 = vsel %vm439_vm0, %v602_v36, %v606_v38  ;;  %v625_v1 = vrot.slane %v623_v48, 1  ;;  %v669_v10 = vrot.slane %v1922_v62, 1 }
  0x36   : > { %v594_v44 = vrot.slane %v592_v32, 1  ;;  %2753 = vst [vmem:[#allocation3_spill] sm:$0xff] %v2051_v55  ;;  %v628_v63 = vshll.u32 %v2044_v46, 16  ;;  %v665_v11 = vrot.slane %v1857_v5, 1  ;;  %v666_v14 = vrot.slane %v1875_v23, 1 }
  0x37   : > { %v626_v21 = vor.u32 %v625_v1, %v621_v60  ;;  %v2069_v28 = vsel %vm664_vm1, %v668_v4, %v669_v10  ;;  %v677_v62 = vrot.slane %v1849_v0, 1  ;;  %v678_v23 = vrot.slane %v1864_v12, 1 }
  0x38   : > { %v2054_v57 = vsel %vm439_vm0, %v590_v42, %v594_v44  ;;  %v630_v24 = vrot.slane %v628_v63, 1  ;;  %v667_v31 = vsel %vm664_vm1, %v665_v11, %v666_v14  ;;  %v674_v33 = vrot.slane %v1883_v30, 1 }
  0x39   : > { %v675_v36 = vrot.slane %v1905_v49, 1  ;;  %v671_v38 = vrot.slane %v1853_v2, 1  ;;  %v672_v42 = vrot.slane %v1871_v18, 1  ;;  %v2087_v44 = vsel %vm664_vm1, %v677_v62, %v678_v23 }
  0x3a   : > { %v2073_v32 = vsel %vm439_vm0, %v626_v21, %v630_v24  ;;  %v686_v12 = vrot.slane %v1916_v59, 1  ;;  %v687_v49 = vrot.slane %v1940_v25, 1  ;;  %v683_v18 = vrot.slane %v1929_v8, 1 }
  0x3b   : > { %v2090_v48 = vsel %vm664_vm1, %v674_v33, %v675_v36  ;;  %v2093_v60 = vsel %vm664_vm1, %v671_v38, %v672_v42  ;;  %v684_v1 = vrot.slane %v1958_v37, 1  ;;  %v680_v63 = vrot.slane %v1869_v16, 1 }
  0x3c   : > { %660 = vrot.lane.b32.xlu2 %v2048_v53, %s1794_s20  ;;  %658 = vrot.lane.b32.xlu1 %v2051_v55, %s1794_s20  ;;  %v681_v4 = vrot.slane %v1880_v29, 1  ;;  %v2108_v10 = vsel %vm664_vm1, %v686_v12, %v687_v49  ;;  %v695_v25 = vrot.slane %v1950_v34, 1  ;;  %v696_v37 = vrot.slane %v1985_v9, 1 }
  0x3d   : > { %656 = vrot.lane.b32.xlu0 %v2054_v57, %s1794_s20  ;;  %v2111_v11 = vsel %vm664_vm1, %v683_v18, %v684_v1  ;;  %v692_v29 = vrot.slane %v1969_v52, 1  ;;  %v693_v21 = vrot.slane %v1999_v26, 1  ;;  %v689_v24 = vrot.slane %v1897_v45, 1 }
  0x3e   : > { %v2114_v14 = vsel %vm664_vm1, %v680_v63, %v681_v4  ;;  %v2129_v62 = vsel %vm664_vm1, %v695_v25, %v696_v37  ;;  %v704_v9 = vrot.slane %v1993_v20, 1  ;;  %v705_v26 = vrot.slane %v2018_v56, 1 }
  0x3f   : > { %v2132_v23 = vsel %vm664_vm1, %v692_v29, %v693_v21  ;;  %v702_v36 = vrot.slane %v2031_v19, 1  ;;  %v698_v38 = vrot.slane %v1943_v27, 1  ;;  %v699_v42 = vrot.slane %v1965_v50, 1 }
  0x40   : > { %2754 = vst [vmem:[#allocation4_spill] sm:$0xff] %v2132_v23  ;;  %v2150_v12 = vsel %vm664_vm1, %v704_v9, %v705_v26  ;;  %v710_v50 = vrot.slane %v2035_v22, 1  ;;  %v711_v56 = vrot.slane %v2044_v46, 1  ;;  %v707_v19 = vrot.slane %v1977_v58, 1 }
  0x41   : > { %v2156_v18 = vsel %vm664_vm1, %v698_v38, %v699_v42  ;;  %v708_v1 = vrot.slane %v2007_v40, 1 }
  0x42   : > { %v2169_v63 = vsel %vm664_vm1, %v710_v50, %v711_v56 }
  0x43   : > { %v2172_v4 = vsel %vm664_vm1, %v707_v19, %v708_v1 }
  0x44   : > { %715 = vrot.lane.b32.xlu2 %v2069_v28, %s1795_s21  ;;  %713 = vrot.lane.b32.xlu1 %v667_v31, %s1795_s21  ;;  %v690_v31 = vrot.slane %v1926_v7, 1  ;;  %v701_v7 = vrot.slane %v2010_v43, 1 }
  0x45   : > { %662 = vrot.lane.b32.xlu0 %v2073_v32, %s1794_s20 }
  0x46   : > { %v2135_v33 = vsel %vm664_vm1, %v689_v24, %v690_v31  ;;  %v2153_v49 = vsel %vm664_vm1, %v701_v7, %v702_v36  ;;  %v2198_v24 = vld [vmem:[%s1846_s19 + $0xc0] sm:$0xff] }
  0x4c   : > { %721 = vrot.lane.b32.xlu2 %v2087_v44, %s1795_s21  ;;  %719 = vrot.lane.b32.xlu1 %v2090_v48, %s1795_s21 }
  0x4d   : > { %717 = vrot.lane.b32.xlu0 %v2093_v60, %s1795_s21 }
  0x54   : > { %727 = vrot.lane.b32.xlu2 %v2108_v10, %s1795_s21  ;;  %725 = vrot.lane.b32.xlu1 %v2111_v11, %s1795_s21 }
  0x55   : > { %723 = vrot.lane.b32.xlu0 %v2114_v14, %s1795_s21 }
  0x5c   : > { %733 = vrot.lane.b32.xlu2 %v2129_v62, %s1795_s21  ;;  %731 = vrot.lane.b32.xlu1 %v2132_v23, %s1795_s21 }
  0x5d   : > { %729 = vrot.lane.b32.xlu0 %v2135_v33, %s1795_s21 }
  0x64   : > { %739 = vrot.lane.b32.xlu2 %v2150_v12, %s1795_s21  ;;  %737 = vrot.lane.b32.xlu1 %v2153_v49, %s1795_s21 }
  0x65   : > { %735 = vrot.lane.b32.xlu0 %v2156_v18, %s1795_s21 }
  0x6c   : > { %750 = vrot.lane.b32.xlu2 %v1889_v39, %s1796_s22  ;;  %743 = vrot.lane.b32.xlu1 %v2169_v63, %s1795_s21 }
  0x6d   : > { %741 = vrot.lane.b32.xlu0 %v2172_v4, %s1795_s21 }
  0x74   : > { %756 = vrot.lane.b32.xlu2 %v1849_v0, %s1796_s22  ;;  %754 = vrot.lane.b32.xlu1 %v1883_v30, %s1796_s22 }
  0x75   : > { %752 = vrot.lane.b32.xlu0 %v1853_v2, %s1796_s22 }
  0x76   : > { %v641_v40 = vpop.permute.xlu2 %640 }
  0x77   : > { %v993_v56 = vsel %vm983_vm3, %v1849_v0, %v641_v40 }
  0x7c   : > { %762 = vrot.lane.b32.xlu2 %v1916_v59, %s1796_s22  ;;  %760 = vrot.lane.b32.xlu1 %v1929_v8, %s1796_s22 }
  0x7d   : > { %758 = vrot.lane.b32.xlu0 %v1869_v16, %s1796_s22 }
  0x7e   : > { %v2185_v46 = vpop.permute.xlu2 %642 }
  0x84   : > { %768 = vrot.lane.b32.xlu2 %v1950_v34, %s1796_s22  ;;  %766 = vrot.lane.b32.xlu1 %v1969_v52, %s1796_s22 }
  0x85   : > { %764 = vrot.lane.b32.xlu0 %v1897_v45, %s1796_s22 }
  0x86   : > { %v2190_v25 = vpop.permute.xlu2 %648 }
  0x8c   : > { %774 = vrot.lane.b32.xlu2 %v1993_v20, %s1796_s22  ;;  %772 = vrot.lane.b32.xlu1 %v2010_v43, %s1796_s22 }
  0x8d   : > { %770 = vrot.lane.b32.xlu0 %v1943_v27, %s1796_s22 }
  0x8e   : > { %v2195_v37 = vpop.permute.xlu2 %654  ;;  %v637_v29 = vpop.permute.xlu1 %636 }
  0x8f   : > { %v633_v21 = vpop.permute.xlu0 %632 }
  0x94   : > { %780 = vrot.lane.b32.xlu2 %v2198_v24, %s1796_s22  ;;  %778 = vrot.lane.b32.xlu1 %v2035_v22, %s1796_s22 }
  0x95   : > { %776 = vrot.lane.b32.xlu0 %v1977_v58, %s1796_s22 }
  0x96   : > { %v2203_v31 = vpop.permute.xlu2 %660  ;;  %v639_v9 = vpop.permute.xlu1 %638 }
  0x97   : > { %v635_v26 = vpop.permute.xlu0 %634 }
  0x98   : > { %v987_v7 = vsel %vm983_vm3, %v1889_v39, %v635_v26 }
  0x9c   : > { %813 = vrot.lane.b32.xlu2 %v2029_v17, %s1797_s23  ;;  %799 = vrot.lane.b32.xlu1 %v1903_v47, %s1797_s23 }
  0x9d   : > { %797 = vrot.lane.b32.xlu0 %v1955_v35, %s1797_s23 }
  0x9e   : > { %v716_v36 = vpop.permute.xlu2 %715  ;;  %v647_v38 = vpop.permute.xlu1 %646 }
  0x9f   : > { %v2214_v42 = vsel %vm1016_vm2, %v987_v7, %v716_v36  ;;  %v645_v50 = vpop.permute.xlu0 %644  ;;  %v999_v40 = vsel %vm983_vm3, %v1916_v59, %v647_v38 }
  0xa4   : > { %856 = vrot.lane.b32.xlu2 %v2150_v12, %s1798_s24  ;;  %848 = vrot.lane.b32.xlu1 %v2132_v23, %s1798_s24  ;;  %v985_v23 = vsel %vm983_vm3, %v1857_v5, %v633_v21  ;;  %v991_v21 = vsel %vm983_vm3, %v1883_v30, %v639_v9 }
  0xa5   : > { %821 = vrot.lane.b32.xlu0 %v2051_v55, %s1797_s23 }
  0xa6   : > { %v722_v39 = vpop.permute.xlu2 %721  ;;  %v653_v35 = vpop.permute.xlu1 %652 }
  0xa7   : > { %v2225_v19 = vsel %vm1016_vm2, %v993_v56, %v722_v39  ;;  %v651_v1 = vpop.permute.xlu0 %650  ;;  %v1005_v39 = vsel %vm983_vm3, %v1950_v34, %v653_v35 }
  0xac   : > { %932 = vrot.lane.b32.xlu2 %v2023_v3, %s1799_s25  ;;  %893 = vrot.lane.b32.xlu1 %v1977_v58, %s1800_s26 }
  0xad   : > { %885 = vrot.lane.b32.xlu0 %v1950_v34, %s1800_s26 }
  0xae   : > { %v728_v26 = vpop.permute.xlu2 %727  ;;  %v659_v7 = vpop.permute.xlu1 %658 }
  0xaf   : > { %v2236_v36 = vsel %vm1016_vm2, %v999_v40, %v728_v26  ;;  %v657_v56 = vpop.permute.xlu0 %656  ;;  %v1011_v34 = vsel %vm983_vm3, %v1993_v20, %v659_v7  ;;  %v997_v7 = vsel %vm983_vm3, %v1929_v8, %v645_v50 }
  0xb4   : > { %975 = vrot.lane.b32.xlu2 %v2172_v4, %s1801_s27  ;;  %967 = vrot.lane.b32.xlu1 %v2129_v62, %s1801_s27 }
  0xb5   : > { %940 = vrot.lane.b32.xlu0 %v2048_v53, %s1799_s25 }
  0xb6   : > { %v734_v38 = vpop.permute.xlu2 %733  ;;  %v714_v26 = vpop.permute.xlu1 %713 }
  0xb7   : > { %v2249_v40 = vsel %vm1016_vm2, %v1005_v39, %v734_v38  ;;  %v1018_v17 = vsel %vm1016_vm2, %v985_v23, %v714_v26  ;;  %v663_v55 = vpop.permute.xlu0 %662  ;;  %v989_v39 = vsel %vm983_vm3, %v1853_v2, %v637_v29 }
  0xbc   : > { %840 = vrot.lane.b32.xlu2 %v2114_v14, %s1798_s24  ;;  %832 = vrot.lane.b32.xlu1 %v2069_v28, %s1798_s24 }
  0xbd   : > { %805 = vrot.lane.b32.xlu0 %v1920_v61, %s1797_s23 }
  0xbe   : > { %v740_v5 = vpop.permute.xlu2 %739  ;;  %v720_v23 = vpop.permute.xlu1 %719 }
  0xbf   : > { %v2263_v35 = vsel %vm1016_vm2, %v1011_v34, %v740_v5  ;;  %v1024_v38 = vsel %vm1016_vm2, %v991_v21, %v720_v23  ;;  %v718_v28 = vpop.permute.xlu0 %717  ;;  %v995_v5 = vsel %vm983_vm3, %v1869_v16, %v2185_v46  ;;  %v1001_v46 = vsel %vm983_vm3, %v1897_v45, %v2190_v25 }
  0xc0   : > { %v1022_v26 = vsel %vm1016_vm2, %v989_v39, %v718_v28 }
  0xc4   : > { %916 = vrot.lane.b32.xlu2 %v1903_v47, %s1799_s25  ;;  %877 = vrot.lane.b32.xlu1 %v1929_v8, %s1800_s26  ;;  %v1003_v8 = vsel %vm983_vm3, %v1969_v52, %v651_v1 }
  0xc5   : > { %869 = vrot.lane.b32.xlu0 %v1853_v2, %s1800_s26 }
  0xc6   : > { %v751_v9 = vpop.permute.xlu2 %750  ;;  %v726_v34 = vpop.permute.xlu1 %725 }
  0xc7   : > { %v2278_v29 = vsel %vm1049_vm4, %v1018_v17, %v751_v9  ;;  %v1030_v47 = vsel %vm1016_vm2, %v997_v7, %v726_v34  ;;  %v724_v21 = vpop.permute.xlu0 %723  ;;  %v1007_v7 = vsel %vm983_vm3, %v1943_v27, %v2195_v37 }
  0xc8   : > { %v1028_v23 = vsel %vm1016_vm2, %v995_v5, %v724_v21 }
  0xcc   : > { %959 = vrot.lane.b32.xlu2 %v2111_v11, %s1801_s27  ;;  %951 = vrot.lane.b32.xlu1 %v2093_v60, %s1801_s27 }
  0xcd   : > { %924 = vrot.lane.b32.xlu0 %v1988_v13, %s1799_s25 }
  0xce   : > { %v757_v2 = vpop.permute.xlu2 %756  ;;  %v732_v17 = vpop.permute.xlu1 %731 }
  0xcf   : > { %v2294_v16 = vsel %vm1049_vm4, %v1024_v38, %v757_v2  ;;  %v1036_v50 = vsel %vm1016_vm2, %v1003_v8, %v732_v17  ;;  %v730_v39 = vpop.permute.xlu0 %729  ;;  %v1009_v38 = vsel %vm983_vm3, %v2010_v43, %v657_v56  ;;  %v1015_v56 = vsel %vm983_vm3, %v2035_v22, %v663_v55 }
  0xd0   : > { %v2301_v28 = vsel %vm1016_vm2, %v1001_v46, %v730_v39 }
  0xd4   : > { %850 = vrot.lane.b32.xlu2 %v2129_v62, %s1798_s24  ;;  %823 = vrot.lane.b32.xlu1 %v2048_v53, %s1797_s23 }
  0xd5   : > { %815 = vrot.lane.b32.xlu0 %v2023_v3, %s1797_s23 }
  0xd6   : > { %v763_v1 = vpop.permute.xlu2 %762  ;;  %v738_v9 = vpop.permute.xlu1 %737 }
  0xd7   : > { %v2312_v25 = vsel %vm1049_vm4, %v1030_v47, %v763_v1  ;;  %v2318_v62 = vsel %vm1016_vm2, %v1009_v38, %v738_v9  ;;  %v736_v34 = vpop.permute.xlu0 %735  ;;  %v1013_v47 = vsel %vm983_vm3, %v1977_v58, %v2203_v31 }
  0xd8   : > { %v1040_v53 = vsel %vm1016_vm2, %v1007_v7, %v736_v34 }
  0xdc   : > { %895 = vrot.lane.b32.xlu2 %v2035_v22, %s1800_s26  ;;  %887 = vrot.lane.b32.xlu1 %v1943_v27, %s1800_s26 }
  0xdd   : > { %858 = vrot.lane.b32.xlu0 %v2172_v4, %s1798_s24 }
  0xde   : > { %v769_v3 = vpop.permute.xlu2 %768  ;;  %v744_v5 = vpop.permute.xlu1 %743 }
  0xdf   : > { %v2330_v37 = vsel %vm1049_vm4, %v1036_v50, %v769_v3  ;;  %v1048_v21 = vsel %vm1016_vm2, %v1015_v56, %v744_v5  ;;  %v742_v2 = vpop.permute.xlu0 %741  ;;  %v1725_v56 = vld [vmem:[%s2746_s1 + $0x8] sm:$0xff]  ;;  %v788_v5 = vshll.u32 %v2198_v24, 16 }
  0xe0   : > { %v1046_v27 = vsel %vm1016_vm2, %v1013_v47, %v742_v2 }
  0xe4   : > { %969 = vrot.lane.b32.xlu2 %v2156_v18, %s1801_s27  ;;  %942 = vrot.lane.b32.xlu1 %v2073_v32, %s1799_s25 }
  0xe5   : > { %934 = vrot.lane.b32.xlu0 %v2015_v51, %s1799_s25 }
  0xe6   : > { %v2343_v22 = vpop.permute.xlu2 %774  ;;  %v755_v55 = vpop.permute.xlu1 %754 }
  0xe7   : > { %v2346_v4 = vsel %vm1049_vm4, %v1022_v26, %v755_v55  ;;  %v753_v58 = vpop.permute.xlu0 %752  ;;  %v786_v55 = vshrl.u32 %v2198_v24, 16 }
  0xe8   : > { %v2350_v31 = vsel %vm1049_vm4, %v2214_v42, %v753_v58  ;;  %v790_v58 = vrot.slane %v788_v5, 1 }
  0xec   : > { %834 = vrot.lane.b32.xlu2 %v2093_v60, %s1798_s24  ;;  %807 = vrot.lane.b32.xlu1 %v1988_v13, %s1797_s23 }
  0xed   : > { %977 = vrot.lane.b32.xlu0 %v2169_v63, %s1801_s27 }
  0xee   : > { %v781_v8 = vpop.permute.xlu2 %780  ;;  %v761_v26 = vpop.permute.xlu1 %760 }
  0xef   : > { %v2359_v17 = vsel %vm1049_vm4, %v1048_v21, %v781_v8  ;;  %v2362_v46 = vsel %vm1049_vm4, %v1028_v23, %v761_v26  ;;  %v759_v50 = vpop.permute.xlu0 %758  ;;  %v791_v26 = vor.u32 %v790_v58, %v786_v55  ;;  %v310_v58 = vld [vmem:[%s1846_s19 + $0xd4] sm:$0x1] }
  0xf0   : > { %v2366_v42 = vsel %vm1049_vm4, %v2225_v19, %v759_v50  ;;  %v1251_v19 = vld [vmem:[%s2746_s1 + $0x10] sm:$0x3] }
  0xf4   : > { %879 = vrot.lane.b32.xlu2 %v1916_v59, %s1800_s26  ;;  %871 = vrot.lane.b32.xlu1 %v1883_v30, %s1800_s26  ;;  %v1265_v59 = vunpack.c.l.b16 %v1251_v19 }
  0xf5   : > { %842 = vrot.lane.b32.xlu0 %v2111_v11, %s1798_s24 }
  0xf6   : > { %v2374_v13 = vpop.permute.xlu2 %813  ;;  %v2376_v60 = vpop.permute.xlu1 %766  ;;  %v1268_v30 = vpack.c.b16 %v1265_v59, %v1265_v59 }
  0xf7   : > { %v765_v23 = vpop.permute.xlu0 %764 }
  0xf8   : > { %v2380_v39 = vsel %vm1049_vm4, %v2236_v36, %v765_v23  ;;  %v307_v36 = vld [vmem:[%s1846_s19 + $0xc8] sm:$0x1]  ;;  %v1306_v1 = vsel %vm1304_vm5, %v1268_v30, 0 }
  0xf9   : > { %1727 = vmatpush.bf16.msra.mxu2 %v1306_v1  ;;  %1728 = vmatpush.bf16.msra.mxu3 %v1306_v1  ;;  %v783_v3 = vunpack.c.l.b16 %v307_v36 }
  0xfa   : > { %1313 = vmatpush.bf16.msra.mxu0 %v1306_v1  ;;  %1726 = vmatpush.bf16.msra.mxu1 %v1306_v1 }
  0xfc   : > { %953 = vrot.lane.b32.xlu2 %v2090_v48, %s1801_s27  ;;  %926 = vrot.lane.b32.xlu1 %v1983_v6, %s1799_s25 }
  0xfd   : > { %918 = vrot.lane.b32.xlu0 %v1935_v15, %s1799_s25  ;;  %1730 = vmatpush.bf16.msra.mxu2 %v1725_v56 }
  0xfe   : > { %v2391_v11 = vpop.permute.xlu2 %856  ;;  %v773_v38 = vpop.permute.xlu1 %772  ;;  %1731 = vmatpush.bf16.msra.mxu3 %v1725_v56  ;;  %1314 = vmatpush.bf16.msra.mxu0 %v1725_v56 }
  0xff   : > { %v2395_v9 = vsel %vm1049_vm4, %v1040_v53, %v773_v38  ;;  %v771_v7 = vpop.permute.xlu0 %770  ;;  %v784_v53 = vpack.c.b16 %v783_v3, %v783_v3  ;;  %1729 = vmatpush.bf16.msra.mxu1 %v1725_v56 }
 0x100   : > { %v2399_v34 = vsel %vm1049_vm4, %v2249_v40, %v771_v7  ;;  %v1724_v40 = vld [vmem:[%s2746_s1] sm:$0xff] }
 0x101   : > { %1733 = vmatpush.bf16.msra.mxu2 %v1724_v40  ;;  %v793_v8 = vshll.u32 %v784_v53, 16 }
 0x102   : > { %1734 = vmatpush.bf16.msra.mxu3 %v1724_v40  ;;  %1315 = vmatpush.bf16.msra.mxu0 %v1724_v40 }
 0x103   : > { %1732 = vmatpush.bf16.msra.mxu1 %v1724_v40 }
 0x104   : > { %825 = vrot.lane.b32.xlu2 %v2073_v32, %s1797_s23  ;;  %817 = vrot.lane.b32.xlu1 %v2015_v51, %s1797_s23 }
 0x105   : > { %961 = vrot.lane.b32.xlu0 %v2108_v10, %s1801_s27 }
 0x106   : > { %v933_v47 = vpop.permute.xlu2 %932  ;;  %v779_v21 = vpop.permute.xlu1 %778 }
 0x107   : > { %v2415_v32 = vsel %vm1049_vm4, %v1046_v27, %v779_v21  ;;  %v777_v2 = vpop.permute.xlu0 %776  ;;  %v795_v27 = vrot.slane %v793_v8, 1  ;;  %v1723_v8 = vld [vmem:[%s1846_s19 + $0xcc] sm:$0xff] }
 0x108   : > { %v2419_v51 = vsel %vm1049_vm4, %v2263_v35, %v777_v2 }
 0x109   : > { %v796_v59 = vsel %vm439_vm0, %v791_v26, %v795_v27  ;;  %v902_v26 = vunpack.c.l.b16 %v310_v58 }
 0x10c   : > { %889 = vrot.lane.b32.xlu2 %v2010_v43, %s1800_s26  ;;  %860 = vrot.lane.b32.xlu1 %v2169_v63, %s1798_s24  ;;  %v830_v63 = vrot.slane %v784_v53, 1 }
 0x10d   : > { %852 = vrot.lane.b32.xlu0 %v2156_v18, %s1798_s24  ;;  %v829_v18 = vrot.slane %v2198_v24, 1 }
 0x10e   : > { %v976_v50 = vpop.permute.xlu2 %975  ;;  %v800_v35 = vpop.permute.xlu1 %799 }
 0x10f   : > { %v2430_v23 = vsel %vm1082_vm6, %v2350_v31, %v800_v35  ;;  %v798_v19 = vpop.permute.xlu0 %797  ;;  %v2442_v31 = vsel %vm664_vm1, %v829_v18, %v830_v63  ;;  %v903_v63 = vpack.c.b16 %v902_v26, %v902_v26 }
 0x114   : > { %944 = vrot.lane.b32.xlu2 %v796_v59, %s1799_s25  ;;  %936 = vrot.lane.b32.xlu1 %v2054_v57, %s1799_s25 }
 0x115   : > { %897 = vrot.lane.b32.xlu0 %v2198_v24, %s1800_s26  ;;  %v1067_v24 = vsel %vm1049_vm4, %v2301_v28, %v2376_v60 }
 0x116   : > { %v2438_v43 = vpop.permute.xlu2 %840  ;;  %v849_v30 = vpop.permute.xlu1 %848  ;;  %v1100_v3 = vsel %vm1082_vm6, %v1067_v24, %v2374_v13 }
 0x117   : > { %v822_v36 = vpop.permute.xlu0 %821  ;;  %v1133_v56 = vsel %vm1115_vm7, %v1100_v3, %v849_v30  ;;  %v912_v3 = vshll.u32 %v903_v63, 16 }
 0x11c   : > { %801 = vrot.lane.b32.xlu2 %v1935_v15, %s1797_s23  ;;  %979 = vrot.lane.b32.xlu1 %v2442_v31, %s1801_s27  ;;  %v1075_v15 = vsel %vm1049_vm4, %v2318_v62, %v2343_v22 }
 0x11d   : > { %971 = vrot.lane.b32.xlu0 %v2153_v49, %s1801_s27  ;;  %v1108_v53 = vsel %vm1082_vm6, %v1075_v15, %v822_v36 }
 0x11e   : > { %v917_v1 = vpop.permute.xlu2 %916  ;;  %v894_v38 = vpop.permute.xlu1 %893  ;;  %v1141_v62 = vsel %vm1115_vm7, %v1108_v53, %v2391_v11 }
 0x11f   : > { %v886_v7 = vpop.permute.xlu0 %885  ;;  %v1174_v60 = vsel %vm1148_vm8, %v1141_v62, %v894_v38 }
 0x120   : > { %v1166_v5 = vsel %vm1148_vm8, %v1133_v56, %v886_v7 }
 0x121   : > { %v1199_v13 = vsel %vm1181_vm9, %v1166_v5, %v933_v47 }
 0x124   : > { %844 = vrot.lane.b32.xlu2 %v2108_v10, %s1798_s24  ;;  %836 = vrot.lane.b32.xlu1 %v2090_v48, %s1798_s24 }
 0x125   : > { %809 = vrot.lane.b32.xlu0 %v1983_v6, %s1797_s23 }
 0x126   : > { %v960_v28 = vpop.permute.xlu2 %959  ;;  %v968_v22 = vpop.permute.xlu1 %967 }
 0x127   : > { %v941_v40 = vpop.permute.xlu0 %940  ;;  %v1232_v10 = vsel %vm1214_vm10, %v1199_v13, %v968_v22  ;;  %v949_v22 = vrot.slane %v903_v63, 1 }
 0x128   : > { %v1207_v48 = vsel %vm1181_vm9, %v1174_v60, %v941_v40  ;;  %1695 = vmatmul.msk.bf16.vlgmr.msra.gmra.mxu2 %vm1271_vm11, %v1232_v10 }
 0x129   : > { %v1240_v6 = vsel %vm1214_vm10, %v1207_v48, %v976_v50 }
 0x12a   : > { %1699 = vmatmul.msk.bf16.vlgmr.msra.gmra.mxu3 %vm1271_vm11, %v1240_v6 }
 0x12c   : > { %920 = vrot.lane.b32.xlu2 %v1893_v41, %s1799_s25  ;;  %881 = vrot.lane.b32.xlu1 %v1897_v45, %s1800_s26 }
 0x12d   : > { %873 = vrot.lane.b32.xlu0 %v1849_v0, %s1800_s26  ;;  %v1084_v0 = vsel %vm1082_vm6, %v2278_v29, %v798_v19  ;;  %v907_v29 = vshll.u32 %v1723_v8, 16 }
 0x12e   : > { %v851_v11 = vpop.permute.xlu2 %850  ;;  %v833_v47 = vpop.permute.xlu1 %832 }
 0x12f   : > { %v806_v21 = vpop.permute.xlu0 %805  ;;  %v1117_v27 = vsel %vm1115_vm7, %v1084_v0, %v833_v47  ;;  %v909_v7 = vrot.slane %v907_v29, 1 }
 0x130   : > { %v1092_v50 = vsel %vm1082_vm6, %v2366_v42, %v806_v21 }
 0x131   : > { %v1125_v19 = vsel %vm1115_vm7, %v1092_v50, %v2438_v43 }
 0x134   : > { %963 = vrot.lane.b32.xlu2 %v2135_v33, %s1801_s27  ;;  %955 = vrot.lane.b32.xlu1 %v2087_v44, %s1801_s27 }
 0x135   : > { %928 = vrot.lane.b32.xlu0 %v1973_v54, %s1799_s25 }
 0x136   : > { %v2488_v2 = vpop.permute.xlu2 %895  ;;  %v878_v55 = vpop.permute.xlu1 %877 }
 0x137   : > { %v870_v45 = vpop.permute.xlu0 %869  ;;  %v1158_v42 = vsel %vm1148_vm8, %v1125_v19, %v878_v55 }
 0x138   : > { %v1150_v35 = vsel %vm1148_vm8, %v1117_v27, %v870_v45 }
 0x139   : > { %v1183_v36 = vsel %vm1181_vm9, %v1150_v35, %v917_v1  ;;  %v914_v1 = vrot.slane %v912_v3, 1 }
 0x13c   : > { %854 = vrot.lane.b32.xlu2 %v2153_v49, %s1798_s24  ;;  %827 = vrot.lane.b32.xlu1 %v796_v59, %s1797_s23  ;;  %v905_v59 = vshrl.u32 %v1723_v8, 16 }
 0x13d   : > { %819 = vrot.lane.b32.xlu0 %v2054_v57, %s1797_s23 }
 0x13e   : > { %v970_v18 = vpop.permute.xlu2 %969  ;;  %v952_v30 = vpop.permute.xlu1 %951  ;;  %v910_v43 = vor.u32 %v909_v7, %v905_v59 }
 0x13f   : > { %v925_v24 = vpop.permute.xlu0 %924  ;;  %v1216_v38 = vsel %vm1214_vm10, %v1183_v36, %v952_v30 }
 0x140   : > { %v1191_v49 = vsel %vm1181_vm9, %v1158_v42, %v925_v24  ;;  %1687 = vmatmul.msk.bf16.vlgmr.msra.gmra.mxu0 %vm1271_vm11, %v1216_v38  ;;  %v915_v5 = vsel %vm439_vm0, %v910_v43, %v914_v1 }
 0x141   : > { %v1224_v57 = vsel %vm1214_vm10, %v1191_v49, %v960_v28  ;;  %v2755_v28 = vld [vmem:[#allocation3_spill] sm:$0xff] }
 0x142   : > { %1691 = vmatmul.msk.bf16.vlgmr.msra.gmra.mxu1 %vm1271_vm11, %v1224_v57 }
 0x144   : > { %899 = vrot.lane.b32.xlu2 %v1723_v8, %s1800_s26  ;;  %891 = vrot.lane.b32.xlu1 %v1993_v20, %s1800_s26  ;;  %v948_v20 = vrot.slane %v1723_v8, 1  ;;  %v2756_v8 = vld [vmem:[#allocation2_spill] sm:$0xff] }
 0x145   : > { %862 = vrot.lane.b32.xlu0 %v2442_v31, %s1798_s24 }
 0x146   : > { %v835_v15 = vpop.permute.xlu2 %834  ;;  %v824_v56 = vpop.permute.xlu1 %823  ;;  %v950_v60 = vsel %vm664_vm1, %v948_v20, %v949_v22 }
 0x147   : > { %v816_v53 = vpop.permute.xlu0 %815  ;;  %v1119_v27 = vsel %vm1115_vm7, %v2430_v23, %v835_v15 }
 0x148   : > { %v1102_v40 = vsel %vm1082_vm6, %v2330_v37, %v816_v53  ;;  %v1110_v37 = vsel %vm1082_vm6, %v2419_v51, %v824_v56 }
 0x14c   : > { %973 = vrot.lane.b32.xlu2 %v2150_v12, %s1801_s27  ;;  %946 = vrot.lane.b32.xlu1 %v915_v5, %s1799_s25  ;;  %v1135_v12 = vsel %vm1115_vm7, %v1102_v40, %v851_v11 }
 0x14d   : > { %938 = vrot.lane.b32.xlu0 %v2755_v28, %s1799_s25 }
 0x14e   : > { %v888_v62 = vpop.permute.xlu1 %887  ;;  %v880_v31 = vpop.permute.xlu2 %879 }
 0x14f   : > { %v859_v13 = vpop.permute.xlu0 %858  ;;  %v1168_v48 = vsel %vm1148_vm8, %v1135_v12, %v888_v62 }
 0x154   : > { %811 = vrot.lane.b32.xlu2 %v1973_v54, %s1797_s23  ;;  %803 = vrot.lane.b32.xlu1 %v1893_v41, %s1797_s23  ;;  %v1143_v41 = vsel %vm1115_vm7, %v1110_v37, %v859_v13  ;;  %v1769_v54 = vld [vmem:[%s1846_s19 + $0x3c] sm:$0xff] }
 0x155   : > { %981 = vrot.lane.b32.xlu0 %v950_v60, %s1801_s27  ;;  %v1176_v11 = vsel %vm1148_vm8, %v1143_v41, %v2488_v2  ;;  %v2757_v2 = vld [vmem:[#allocation4_spill] sm:$0xff] }
 0x156   : > { %v943_v10 = vpop.permute.xlu1 %942  ;;  %v954_v55 = vpop.permute.xlu2 %953 }
 0x157   : > { %v935_v6 = vpop.permute.xlu0 %934  ;;  %v1209_v51 = vsel %vm1181_vm9, %v1176_v11, %v943_v10 }
 0x158   : > { %v1201_v47 = vsel %vm1181_vm9, %v1168_v48, %v935_v6 }
 0x159   : > { %v1234_v21 = vsel %vm1214_vm10, %v1201_v47, %v970_v18 }
 0x15a   : > { %1696 = vmatmul.msk.bf16.gmra.mxu2 %vm1271_vm11, %v1234_v21 }
 0x15c   : > { %875 = vrot.lane.b32.xlu2 %v1769_v54, %s1800_s26  ;;  %846 = vrot.lane.b32.xlu1 %v2135_v33, %s1798_s24 }
 0x15d   : > { %838 = vrot.lane.b32.xlu0 %v2087_v44, %s1798_s24 }
 0x15e   : > { %v808_v58 = vpop.permute.xlu1 %807  ;;  %v826_v26 = vpop.permute.xlu2 %825 }
 0x15f   : > { %v978_v45 = vpop.permute.xlu0 %977  ;;  %v1094_v29 = vsel %vm1082_vm6, %v2362_v46, %v808_v58  ;;  %v1112_v7 = vsel %vm1082_vm6, %v2415_v32, %v826_v26 }
 0x160   : > { %v1242_v0 = vsel %vm1214_vm10, %v1209_v51, %v978_v45 }
 0x161   : > { %1700 = vmatmul.msk.bf16.gmra.mxu3 %vm1271_vm11, %v1242_v0 }
 0x164   : > { %930 = vrot.lane.b32.xlu2 %v2756_v8, %s1799_s25  ;;  %922 = vrot.lane.b32.xlu1 %v1920_v61, %s1799_s25 }
 0x165   : > { %883 = vrot.lane.b32.xlu0 %v1969_v52, %s1800_s26 }
 0x166   : > { %v872_v44 = vpop.permute.xlu1 %871  ;;  %v890_v50 = vpop.permute.xlu2 %889 }
 0x167   : > { %v843_v33 = vpop.permute.xlu0 %842  ;;  %v1152_v18 = vsel %vm1148_vm8, %v1119_v27, %v872_v44 }
 0x168   : > { %v1127_v19 = vsel %vm1115_vm7, %v1094_v29, %v843_v33 }
 0x16c   : > { %965 = vrot.lane.b32.xlu1 %v2757_v2, %s1801_s27 }
 0x16d   : > { %957 = vrot.lane.b32.xlu0 %v2114_v14, %s1801_s27  ;;  %v1160_v14 = vsel %vm1148_vm8, %v1127_v19, %v880_v31 }
 0x16e   : > { %v927_v35 = vpop.permute.xlu1 %926  ;;  %v945_v42 = vpop.permute.xlu2 %944 }
 0x16f   : > { %v919_v63 = vpop.permute.xlu0 %918  ;;  %v1193_v23 = vsel %vm1181_vm9, %v1160_v14, %v927_v35 }
 0x170   : > { %v1185_v61 = vsel %vm1181_vm9, %v1152_v18, %v919_v63 }
 0x171   : > { %v1218_v52 = vsel %vm1214_vm10, %v1185_v61, %v954_v55 }
 0x172   : > { %1688 = vmatmul.msk.bf16.gmra.mxu0 %vm1271_vm11, %v1218_v52 }
 0x176   : > { %v818_v30 = vpop.permute.xlu1 %817  ;;  %v802_v57 = vpop.permute.xlu2 %801 }
 0x177   : > { %v962_v36 = vpop.permute.xlu0 %961  ;;  %v1104_v3 = vsel %vm1082_vm6, %v2399_v34, %v818_v30  ;;  %v1088_v10 = vsel %vm1082_vm6, %v2346_v4, %v802_v57 }
 0x178   : > { %v1226_v24 = vsel %vm1214_vm10, %v1193_v23, %v962_v36 }
 0x179   : > { %1692 = vmatmul.msk.bf16.gmra.mxu1 %vm1271_vm11, %v1226_v24 }
 0x17e   : > { %v861_v38 = vpop.permute.xlu1 %860  ;;  %v845_v56 = vpop.permute.xlu2 %844 }
 0x17f   : > { %v853_v49 = vpop.permute.xlu0 %852  ;;  %v1145_v43 = vsel %vm1115_vm7, %v1112_v7, %v861_v38 }
 0x180   : > { %v1137_v1 = vsel %vm1115_vm7, %v1104_v3, %v853_v49 }
 0x181   : > { %v1170_v53 = vsel %vm1148_vm8, %v1137_v1, %v890_v50 }
 0x186   : > { %v937_v59 = vpop.permute.xlu1 %936  ;;  %v921_v34 = vpop.permute.xlu2 %920 }
 0x187   : > { %v898_v46 = vpop.permute.xlu0 %897  ;;  %v1203_v62 = vsel %vm1181_vm9, %v1170_v53, %v937_v59 }
 0x188   : > { %v1178_v15 = vsel %vm1148_vm8, %v1145_v43, %v898_v46 }
 0x189   : > { %v1211_v28 = vsel %vm1181_vm9, %v1178_v15, %v945_v42 }
 0x18e   : > { %v980_v5 = vpop.permute.xlu1 %979  ;;  %v964_v12 = vpop.permute.xlu2 %963 }
 0x18f   : > { %v972_v20 = vpop.permute.xlu0 %971  ;;  %v1244_v32 = vsel %vm1214_vm10, %v1211_v28, %v980_v5 }
 0x190   : > { %v1236_v22 = vsel %vm1214_vm10, %v1203_v62, %v972_v20  ;;  %1701 = vmatmul.msk.bf16.gmra.mxu3 %vm1271_vm11, %v1244_v32 }
 0x191   : > { %1697 = vmatmul.msk.bf16.gmra.mxu2 %vm1271_vm11, %v1236_v22 }
 0x196   : > { %v837_v13 = vpop.permute.xlu1 %836  ;;  %v855_v51 = vpop.permute.xlu2 %854 }
 0x197   : > { %v810_v31 = vpop.permute.xlu0 %809  ;;  %v1121_v48 = vsel %vm1115_vm7, %v1088_v10, %v837_v13 }
 0x198   : > { %v1096_v6 = vsel %vm1082_vm6, %v2312_v25, %v810_v31  ;;  %v2602_v25 = vld [vmem:[%s2747_s2] ss:$0 sm:$0xff] }
 0x199   : > { %v1129_v21 = vsel %vm1115_vm7, %v1096_v6, %v845_v56 }
 0x19e   : > { %v882_v60 = vpop.permute.xlu1 %881  ;;  %v900_v35 = vpop.permute.xlu2 %899 }
 0x19f   : > { %v874_v40 = vpop.permute.xlu0 %873  ;;  %v1162_v41 = vsel %vm1148_vm8, %v1129_v21, %v882_v60 }
 0x1a0   : > { %v1154_v47 = vsel %vm1148_vm8, %v1121_v48, %v874_v40 }
 0x1a1   : > { %v1187_v55 = vsel %vm1181_vm9, %v1154_v47, %v921_v34 }
 0x1a6   : > { %v956_v37 = vpop.permute.xlu1 %955  ;;  %v974_v36 = vpop.permute.xlu2 %973 }
 0x1a7   : > { %v929_v54 = vpop.permute.xlu0 %928  ;;  %v1220_v11 = vsel %vm1214_vm10, %v1187_v55, %v956_v37 }
 0x1a8   : > { %v1195_v4 = vsel %vm1181_vm9, %v1162_v41, %v929_v54  ;;  %1689 = vmatmul.msk.bf16.gmra.mxu0 %vm1271_vm11, %v1220_v11 }
 0x1a9   : > { %v1228_v58 = vsel %vm1214_vm10, %v1195_v4, %v964_v12 }
 0x1aa   : > { %1693 = vmatmul.msk.bf16.gmra.mxu1 %vm1271_vm11, %v1228_v58 }
 0x1ab   : > { %v1357_v45 = vpop.f32.mrf.mxu2 }
 0x1ac   : > { %v1358_v0 = vadd.f32 %v2602_v25, %v1357_v45 }
 0x1ad   : > { %v1377_v8 = vpop.f32.mrf.mxu3 }
 0x1ae   : > { %v1413_v26 = vmax.f32 %v1358_v0, 0.0  ;;  %v1378_v44 = vadd.f32 %v2602_v25, %v1377_v8  ;;  %v828_v33 = vpop.permute.xlu1 %827  ;;  %v812_v13 = vpop.permute.xlu2 %811 }
 0x1af   : > { %v820_v2 = vpop.permute.xlu0 %819  ;;  %v1098_v6 = vsel %vm1082_vm6, %v2380_v39, %v812_v13 }
 0x1b0   : > { %1445 = vst.msk [vmem:[%s2611_s16 + $0x80] sm:$0xff] %vm983_vm3, %v1413_v26  ;;  %v1421_v27 = vmax.f32 %v1378_v44, 0.0  ;;  %v1106_v30 = vsel %vm1082_vm6, %v2395_v9, %v820_v2  ;;  %v1114_v9 = vsel %vm1082_vm6, %v2359_v17, %v828_v33 }
 0x1b1   : > { %v1139_v42 = vsel %vm1115_vm7, %v1106_v30, %v855_v51 }
 0x1b2   : > { %1453 = vst.msk [vmem:[%s2611_s16 + $0xc0] sm:$0xff] %vm983_vm3, %v1421_v27 }
 0x1b3   : > { %v1359_v50 = vpop.f32.mrf.mxu2 }
 0x1b4   : > { %v1360_v18 = vadd.f32 %v2602_v25, %v1359_v50 }
 0x1b5   : > { %v1379_v63 = vpop.f32.mrf.mxu3 }
 0x1b6   : > { %v1414_v61 = vmax.f32 %v1360_v18, 0.0  ;;  %v1380_v52 = vadd.f32 %v2602_v25, %v1379_v63  ;;  %v892_v29 = vpop.permute.xlu1 %891  ;;  %v876_v12 = vpop.permute.xlu2 %875 }
 0x1b7   : > { %v863_v19 = vpop.permute.xlu0 %862  ;;  %v1172_v49 = vsel %vm1148_vm8, %v1139_v42, %v892_v29 }
 0x1b8   : > { %1446 = vst.msk [vmem:[%s2611_s16 + $0x88] sm:$0xff] %vm983_vm3, %v1414_v61  ;;  %v1422_v14 = vmax.f32 %v1380_v52, 0.0  ;;  %v1147_v15 = vsel %vm1115_vm7, %v1114_v9, %v863_v19 }
 0x1b9   : > { %v1180_v53 = vsel %vm1148_vm8, %v1147_v15, %v900_v35 }
 0x1ba   : > { %1454 = vst.msk [vmem:[%s2611_s16 + $0xc8] sm:$0xff] %vm983_vm3, %v1422_v14 }
 0x1bd   : > { %v1317_v23 = vpop.f32.mrf.mxu0 }
 0x1be   : > { %v1318_v24 = vadd.f32 %v2602_v25, %v1317_v23  ;;  %v947_v38 = vpop.permute.xlu1 %946  ;;  %v931_v41 = vpop.permute.xlu2 %930 }
 0x1bf   : > { %v1337_v57 = vpop.f32.mrf.mxu1  ;;  %v939_v59 = vpop.permute.xlu0 %938  ;;  %v1213_v62 = vsel %vm1181_vm9, %v1180_v53, %v947_v38 }
 0x1c0   : > { %v1397_v46 = vmax.f32 %v1318_v24, 0.0  ;;  %v1338_v7 = vadd.f32 %v2602_v25, %v1337_v57  ;;  %v1205_v3 = vsel %vm1181_vm9, %v1172_v49, %v939_v59 }
 0x1c1   : > { %v1238_v43 = vsel %vm1214_vm10, %v1205_v3, %v974_v36 }
 0x1c2   : > { %1429 = vst.msk [vmem:[%s2611_s16] sm:$0xff] %vm983_vm3, %v1397_v46  ;;  %v1405_v1 = vmax.f32 %v1338_v7, 0.0  ;;  %1698 = vmatmul.msk.bf16.gmra.mxu2 %vm1271_vm11, %v1238_v43 }
 0x1c4   : > { %1437 = vst.msk [vmem:[%s2611_s16 + $0x40] sm:$0xff] %vm983_vm3, %v1405_v1 }
 0x1c5   : > { %v1319_v56 = vpop.f32.mrf.mxu0 }
 0x1c6   : > { %v1320_v5 = vadd.f32 %v2602_v25, %v1319_v56  ;;  %v804_v28 = vpop.permute.xlu1 %803 }
 0x1c7   : > { %v1339_v17 = vpop.f32.mrf.mxu1  ;;  %v982_v20 = vpop.permute.xlu0 %981  ;;  %v1090_v47 = vsel %vm1082_vm6, %v2294_v16, %v804_v28 }
 0x1c8   : > { %v1398_v32 = vmax.f32 %v1320_v5, 0.0  ;;  %v1340_v22 = vadd.f32 %v2602_v25, %v1339_v17  ;;  %v1246_v34 = vsel %vm1214_vm10, %v1213_v62, %v982_v20 }
 0x1c9   : > { %1702 = vmatmul.msk.bf16.gmra.mxu3 %vm1271_vm11, %v1246_v34 }
 0x1ca   : > { %1430 = vst.msk [vmem:[%s2611_s16 + $0x8] sm:$0xff] %vm983_vm3, %v1398_v32  ;;  %v1406_v31 = vmax.f32 %v1340_v22, 0.0 }
 0x1cc   : > { %1438 = vst.msk [vmem:[%s2611_s16 + $0x48] sm:$0xff] %vm983_vm3, %v1406_v31 }
 0x1ce   : > { %v847_v60 = vpop.permute.xlu1 %846 }
 0x1cf   : > { %v839_v40 = vpop.permute.xlu0 %838  ;;  %v1131_v21 = vsel %vm1115_vm7, %v1098_v6, %v847_v60 }
 0x1d0   : > { %v1123_v37 = vsel %vm1115_vm7, %v1090_v47, %v839_v40 }
 0x1d1   : > { %v1156_v11 = vsel %vm1148_vm8, %v1123_v37, %v876_v12 }
 0x1d6   : > { %v923_v10 = vpop.permute.xlu1 %922 }
 0x1d7   : > { %v884_v48 = vpop.permute.xlu0 %883  ;;  %v1189_v16 = vsel %vm1181_vm9, %v1156_v11, %v923_v10 }
 0x1d8   : > { %v1164_v55 = vsel %vm1148_vm8, %v1131_v21, %v884_v48 }
 0x1d9   : > { %v1197_v4 = vsel %vm1181_vm9, %v1164_v55, %v931_v41 }
 0x1dd   : > { %v1362_v54 = vpop.f32.mrf.mxu2 }
 0x1de   : > { %v1363_v58 = vadd.f32 %v2602_v25, %v1362_v54  ;;  %v966_v39 = vpop.permute.xlu1 %965 }
 0x1df   : > { %v958_v51 = vpop.permute.xlu0 %957  ;;  %v1230_v45 = vsel %vm1214_vm10, %v1197_v4, %v966_v39 }
 0x1e0   : > { %v1415_v0 = vmax.f32 %v1363_v58, 0.0  ;;  %v1222_v8 = vsel %vm1214_vm10, %v1189_v16, %v958_v51  ;;  %1694 = vmatmul.msk.bf16.gmra.mxu1 %vm1271_vm11, %v1230_v45 }
 0x1e1   : > { %1690 = vmatmul.msk.bf16.gmra.mxu0 %vm1271_vm11, %v1222_v8 }
 0x1e2   : > { %1447 = vst.msk [vmem:[%s2611_s16 + $0x90] sm:$0xff] %vm983_vm3, %v1415_v0 }
 0x1e4   : > { %v1382_v26 = vpop.f32.mrf.mxu3 }
 0x1e5   : > { %v1383_v44 = vadd.f32 %v2602_v25, %v1382_v26  ;;  %v1364_v33 = vpop.f32.mrf.mxu2 }
 0x1e6   : > { %v1365_v2 = vadd.f32 %v2602_v25, %v1364_v33 }
 0x1e7   : > { %v1423_v27 = vmax.f32 %v1383_v44, 0.0 }
 0x1e8   : > { %v1416_v50 = vmax.f32 %v1365_v2, 0.0 }
 0x1e9   : > { %1455 = vst.msk [vmem:[%s2611_s16 + $0xd0] sm:$0xff] %vm983_vm3, %v1423_v27 }
 0x1ea   : > { %1448 = vst.msk [vmem:[%s2611_s16 + $0x98] sm:$0xff] %vm983_vm3, %v1416_v50 }
 0x1ec   : > { %v1384_v35 = vpop.f32.mrf.mxu3 }
 0x1ed   : > { %v1385_v18 = vadd.f32 %v2602_v25, %v1384_v35 }
 0x1ef   : > { %v1424_v63 = vmax.f32 %v1385_v18, 0.0  ;;  %v1322_v61 = vpop.f32.mrf.mxu0 }
 0x1f0   : > { %v1323_v52 = vadd.f32 %v2602_v25, %v1322_v61 }
 0x1f1   : > { %1456 = vst.msk [vmem:[%s2611_s16 + $0xd8] sm:$0xff] %vm983_vm3, %v1424_v63 }
 0x1f2   : > { %v1399_v29 = vmax.f32 %v1323_v52, 0.0 }
 0x1f4   : > { %1431 = vst.msk [vmem:[%s2611_s16 + $0x10] sm:$0xff] %vm983_vm3, %v1399_v29 }
 0x1f6   : > { %v1342_v19 = vpop.f32.mrf.mxu1 }
 0x1f7   : > { %v1343_v14 = vadd.f32 %v2602_v25, %v1342_v19  ;;  %v1324_v30 = vpop.f32.mrf.mxu0 }
 0x1f8   : > { %v1325_v23 = vadd.f32 %v2602_v25, %v1324_v30 }
 0x1f9   : > { %v1407_v36 = vmax.f32 %v1343_v14, 0.0 }
 0x1fa   : > { %v1400_v42 = vmax.f32 %v1325_v23, 0.0 }
 0x1fb   : > { %1439 = vst.msk [vmem:[%s2611_s16 + $0x50] sm:$0xff] %vm983_vm3, %v1407_v36 }
 0x1fc   : > { %1432 = vst.msk [vmem:[%s2611_s16 + $0x18] sm:$0xff] %vm983_vm3, %v1400_v42 }
 0x1fe   : > { %v1344_v24 = vpop.f32.mrf.mxu1 }
 0x1ff   : > { %v1345_v38 = vadd.f32 %v2602_v25, %v1344_v24 }
 0x201   : > { %v1408_v49 = vmax.f32 %v1345_v38, 0.0 }
 0x203   : > { %1440 = vst.msk [vmem:[%s2611_s16 + $0x58] sm:$0xff] %vm983_vm3, %v1408_v49 }
 0x213   : > { %v1387_v57 = vpop.f32.mrf.mxu3 }
 0x214   : > { %v1367_v59 = vpop.f32.mrf.mxu2  ;;  %v1388_v46 = vadd.f32 %v2602_v25, %v1387_v57 }
 0x215   : > { %v1368_v7 = vadd.f32 %v2602_v25, %v1367_v59 }
 0x216   : > { %v1425_v3 = vmax.f32 %v1388_v46, 0.0 }
 0x217   : > { %v1417_v43 = vmax.f32 %v1368_v7, 0.0 }
 0x218   : > { %1457 = vst.msk [vmem:[%s2611_s16 + $0xe0] sm:$0xff] %vm983_vm3, %v1425_v3 }
 0x219   : > { %1449 = vst.msk [vmem:[%s2611_s16 + $0xa0] sm:$0xff] %vm983_vm3, %v1417_v43 }
 0x21b   : > { %v1389_v9 = vpop.f32.mrf.mxu3 }
 0x21c   : > { %v1369_v1 = vpop.f32.mrf.mxu2  ;;  %v1390_v15 = vadd.f32 %v2602_v25, %v1389_v9 }
 0x21d   : > { %v1370_v56 = vadd.f32 %v2602_v25, %v1369_v1 }
 0x21e   : > { %v1426_v53 = vmax.f32 %v1390_v15, 0.0 }
 0x21f   : > { %v1418_v5 = vmax.f32 %v1370_v56, 0.0 }
 0x220   : > { %1458 = vst.msk [vmem:[%s2611_s16 + $0xe8] sm:$0xff] %vm983_vm3, %v1426_v53 }
 0x221   : > { %1450 = vst.msk [vmem:[%s2611_s16 + $0xa8] sm:$0xff] %vm983_vm3, %v1418_v5 }
 0x225   : > { %v1327_v28 = vpop.f32.mrf.mxu0 }
 0x226   : > { %v1328_v62 = vadd.f32 %v2602_v25, %v1327_v28 }
 0x227   : > { %v1347_v17 = vpop.f32.mrf.mxu1 }
 0x228   : > { %v1401_v20 = vmax.f32 %v1328_v62, 0.0  ;;  %v1348_v32 = vadd.f32 %v2602_v25, %v1347_v17 }
 0x22a   : > { %1433 = vst.msk [vmem:[%s2611_s16 + $0x20] sm:$0xff] %vm983_vm3, %v1401_v20  ;;  %v1409_v22 = vmax.f32 %v1348_v32, 0.0 }
 0x22c   : > { %1441 = vst.msk [vmem:[%s2611_s16 + $0x60] sm:$0xff] %vm983_vm3, %v1409_v22 }
 0x22d   : > { %v1329_v34 = vpop.f32.mrf.mxu0 }
 0x22e   : > { %v1330_v13 = vadd.f32 %v2602_v25, %v1329_v34 }
 0x22f   : > { %v1349_v31 = vpop.f32.mrf.mxu1 }
 0x230   : > { %v1402_v60 = vmax.f32 %v1330_v13, 0.0  ;;  %v1350_v40 = vadd.f32 %v2602_v25, %v1349_v31 }
 0x232   : > { %1434 = vst.msk [vmem:[%s2611_s16 + $0x28] sm:$0xff] %vm983_vm3, %v1402_v60  ;;  %v1410_v12 = vmax.f32 %v1350_v40, 0.0 }
 0x234   : > { %1442 = vst.msk [vmem:[%s2611_s16 + $0x68] sm:$0xff] %vm983_vm3, %v1410_v12 }
 0x245   : > { %v1372_v10 = vpop.f32.mrf.mxu2 }
 0x246   : > { %v1373_v48 = vadd.f32 %v2602_v25, %v1372_v10 }
 0x248   : > { %v1419_v6 = vmax.f32 %v1373_v48, 0.0 }
 0x24a   : > { %1451 = vst.msk [vmem:[%s2611_s16 + $0xb0] sm:$0xff] %vm983_vm3, %v1419_v6 }
 0x24c   : > { %v1392_v47 = vpop.f32.mrf.mxu3 }
 0x24d   : > { %v1393_v21 = vadd.f32 %v2602_v25, %v1392_v47  ;;  %v1374_v37 = vpop.f32.mrf.mxu2 }
 0x24e   : > { %v1375_v55 = vadd.f32 %v2602_v25, %v1374_v37 }
 0x24f   : > { %v1427_v41 = vmax.f32 %v1393_v21, 0.0 }
 0x250   : > { %v1420_v54 = vmax.f32 %v1375_v55, 0.0 }
 0x251   : > { %1459 = vst.msk [vmem:[%s2611_s16 + $0xf0] sm:$0xff] %vm983_vm3, %v1427_v41 }
 0x252   : > { %1452 = vst.msk [vmem:[%s2611_s16 + $0xb8] sm:$0xff] %vm983_vm3, %v1420_v54 }
 0x254   : > { %v1394_v11 = vpop.f32.mrf.mxu3 }
 0x255   : > { %v1395_v4 = vadd.f32 %v2602_v25, %v1394_v11 }
 0x257   : > { %v1428_v58 = vmax.f32 %v1395_v4, 0.0 }
 0x259   : > { %1460 = vst.msk [vmem:[%s2611_s16 + $0xf8] sm:$0xff] %vm983_vm3, %v1428_v58 }
 0x25d   : > { %v1352_v39 = vpop.f32.mrf.mxu1 }
 0x25e   : > { %v1332_v16 = vpop.f32.mrf.mxu0  ;;  %v1353_v51 = vadd.f32 %v2602_v25, %v1352_v39 }
 0x25f   : > { %v1333_v45 = vadd.f32 %v2602_v25, %v1332_v16 }
 0x260   : > { %v1411_v0 = vmax.f32 %v1353_v51, 0.0 }
 0x261   : > { %v1403_v8 = vmax.f32 %v1333_v45, 0.0 }
 0x262   : > { %1443 = vst.msk [vmem:[%s2611_s16 + $0x70] sm:$0xff] %vm983_vm3, %v1411_v0 }
 0x263   : > { %1435 = vst.msk [vmem:[%s2611_s16 + $0x30] sm:$0xff] %vm983_vm3, %v1403_v8 }
 0x265   : > { %v1354_v26 = vpop.f32.mrf.mxu1 }
 0x266   : > { %v1334_v44 = vpop.f32.mrf.mxu0  ;;  %v1355_v33 = vadd.f32 %v2602_v25, %v1354_v26 }
 0x267   : > { %v1335_v2 = vadd.f32 %v2602_v25, %v1334_v44 }
 0x268   : > { %v1412_v27 = vmax.f32 %v1355_v33, 0.0 }
 0x269   : > { %v1404_v50 = vmax.f32 %v1335_v2, 0.0 }
 0x26a   : > { %1444 = vst.msk [vmem:[%s2611_s16 + $0x78] sm:$0xff] %vm983_vm3, %v1412_v27 }
 0x26b   : > { %1436 = vst.msk [vmem:[%s2611_s16 + $0x38] sm:$0xff] %vm983_vm3, %v1404_v50 }
 0x26c PF: > { %s13_s14 = sadd.s32 1, %s1792_s14   ;;  %s2758_s12 = smov %s1788_s13 }
 0x26d   : > { %p10_p5 = scmp.ge.s32.totalorder %s13_s14, 4   ;;  %s2759_s13 = smov %s2761_s15 }
 0x26f   :  { %12 = sbr.rel (!%p10_p5) target bundleno = 2 (0x2), region = 68 }

</bundles_post_ra>
